<compile_context>
chip_gen: v6e
topology: v6e:2x2x1
jax: 0.10.0
libtpu: 0.0.40
codegen_flags: <defaults>
</compile_context>

<pallas_src>
import functools

import jax
import jax.numpy as jnp
from jax.experimental import pallas as pl
from jax.experimental.pallas import tpu as pltpu


def _cdiv(a, b):
    return -(-a // b)


def _round_up(x, m):
    return ((x + m - 1) // m) * m


def _token_classifier_kernel(x_ref, w1_ref, b1_ref, w2_ref, b2_ref, o_ref):
    # x_ref:  (TM, C) f32   -> cast to bf16 here (VPU, hidden under the MXU)
    # w1_ref: (C, H)  bf16,  b1_ref: (1, H) f32
    # w2_ref: (H, K)  bf16,  b2_ref: (1, K) f32
    # o_ref:  (TM, K) f32
    x = x_ref[...].astype(w1_ref.dtype)
    # First matmul on the MXU with f32 accumulation; bias + ReLU in f32 on the VPU.
    h = jnp.dot(x, w1_ref[...], preferred_element_type=jnp.float32) + b1_ref[...]
    h = jnp.maximum(h, 0.0)
    # Second matmul: bf16 activations into the MXU, f32 accumulation.
    o = jnp.dot(h.astype(w2_ref.dtype), w2_ref[...],
                preferred_element_type=jnp.float32) + b2_ref[...]
    o_ref[...] = o.astype(o_ref.dtype)


def prepare_params(w1, b1, w2, b2):
    """One-time weight prep (hoisted out of the per-call path): bf16 matmul weights."""
    return (w1.astype(jnp.bfloat16), b1.astype(jnp.float32),
            w2.astype(jnp.bfloat16), b2.astype(jnp.float32))


@functools.partial(jax.jit, static_argnames=("tile_m",))
def token_classifier_forward(x, w1, b1, w2, b2, *, tile_m=512):
    """x: (N, B, C) float32. Returns (N, B, num_class) float32.

    w1: (C, H) bf16, b1: (1, H) f32, w2: (H, K) bf16, b2: (1, K) f32  (H = C // 2).
    """
    N, B, C = x.shape
    H = w1.shape[1]
    K = w2.shape[1]
    M = N * B

    # Row-tile size: multiple of 8 sublanes; for small M split into at least two
    # tiles so the "parallel" axis gives both v7x TensorCores work.
    if M <= tile_m:
        TM = max(8, _round_up(_cdiv(M, 2), 8))
    else:
        TM = tile_m
    grid_m = _cdiv(M, TM)   # ragged last tile: OOB rows are write-masked by Pallas

    # VMEM budget: 3/4 of physical capacity (48 MiB on v7x, 96 MiB on v5e/v6e).
    try:
        vmem_cap = pltpu.get_tpu_info().vmem_capacity_bytes
    except Exception:
        vmem_cap = 64 << 20
    vmem_limit = int(min((vmem_cap * 3) // 4, 100 << 20))

    x2d = x.reshape(M, C)

    out2d = pl.pallas_call(
        _token_classifier_kernel,
        out_shape=jax.ShapeDtypeStruct((M, K), jnp.float32),
        grid_spec=pltpu.PrefetchScalarGridSpec(
            num_scalar_prefetch=0,
            grid=(grid_m,),
            in_specs=[
                pl.BlockSpec((TM, C), lambda i: (i, 0)),   # x row tile (pipelined)
                pl.BlockSpec((C, H), lambda i: (0, 0)),    # w1 (VMEM-resident)
                pl.BlockSpec((1, H), lambda i: (0, 0)),    # b1
                pl.BlockSpec((H, K), lambda i: (0, 0)),    # w2
                pl.BlockSpec((1, K), lambda i: (0, 0)),    # b2
            ],
            out_specs=pl.BlockSpec((TM, K), lambda i: (i, 0)),  # only K cols to HBM
        ),
        compiler_params=pltpu.CompilerParams(
            dimension_semantics=("parallel",),   # shard row tiles across TCs (v7x)
            vmem_limit_bytes=vmem_limit,
        ),
    )(x2d, w1, b1, w2, b2)

    # No slicing needed: output was never padded.
    return out2d.reshape(N, B, K)


def make_params(key, embed_dim, num_class=2):
    """Deterministic synthetic parameters mirroring nn.Linear shapes.

    PyTorch Linear(embed_dim, hidden) stores weight (hidden, embed_dim); we keep
    the transpose (embed_dim, hidden) so the kernel computes x @ W.
    """
    hidden_dim = embed_dim // 2
    k1, k2, k3, k4 = jax.random.split(key, 4)
    bound1 = 1.0 / (embed_dim ** 0.5)
    bound2 = 1.0 / (hidden_dim ** 0.5)
    w1 = jax.random.uniform(k1, (embed_dim, hidden_dim), jnp.float32, -bound1, bound1)
    b1 = jax.random.uniform(k2, (1, hidden_dim), jnp.float32, -bound1, bound1)
    w2 = jax.random.uniform(k3, (hidden_dim, num_class), jnp.float32, -bound2, bound2)
    b2 = jax.random.uniform(k4, (1, num_class), jnp.float32, -bound2, bound2)
    return w1, b1, w2, b2


if __name__ == "__main__":
    key = jax.random.PRNGKey(0)
    kx, kp = jax.random.split(key)

    # x: (N, B, C) — tokens, batch, channels (small demo shapes)
    N, B, C = 8, 2, 32
    num_class = 2
    x = jax.random.normal(kx, (N, B, C), dtype=jnp.float32)
    w1, b1, w2, b2 = make_params(kp, C, num_class)

    # One-time weight cast, hoisted out of the per-call path.
    w1p, b1p, w2p, b2p = prepare_params(w1, b1, w2, b2)

    out = token_classifier_forward(x, w1p, b1p, w2p, b2p)
    out = jax.block_until_ready(out)

    # Reference in plain JAX using the same bf16 casts for the matmul inputs
    # (only difference vs the kernel is MXU accumulation order).
    bf16 = jnp.bfloat16
    x2d = x.reshape(-1, C)
    h_ref = jnp.dot(x2d.astype(bf16), w1.astype(bf16),
                    preferred_element_type=jnp.float32) + b1
    h_ref = jnp.maximum(h_ref, 0.0)
    ref = jnp.dot(h_ref.astype(bf16), w2.astype(bf16),
                  preferred_element_type=jnp.float32) + b2
    ref = ref.reshape(N, B, num_class)

    # Pure-f32 PyTorch-equivalent reference with a bf16-appropriate tolerance.
    ref_f32 = (jnp.maximum(x2d @ w1 + b1, 0.0) @ w2 + b2).reshape(N, B, num_class)

    assert out.shape == (N, B, num_class)
    assert jnp.allclose(out, ref, atol=1e-3, rtol=1e-3)
    assert jnp.allclose(out, ref_f32, atol=3e-2, rtol=3e-2)

    print("KERNEL_OK")
</pallas_src>

<mosaic_0001>
module attributes {stable_mosaic.version = 11 : i64} {
  func.func @_token_classifier_kernel(%arg0: i32, %arg1: memref<8x32xf32, #tpu.memory_space<vmem>>, %arg2: memref<32x16xbf16, #tpu.memory_space<vmem>>, %arg3: memref<1x16xf32, #tpu.memory_space<vmem>>, %arg4: memref<16x2xbf16, #tpu.memory_space<vmem>>, %arg5: memref<1x2xf32, #tpu.memory_space<vmem>>, %arg6: memref<8x2xf32, #tpu.memory_space<vmem>>) attributes {dimension_semantics = [#tpu.dimension_semantics<parallel>], iteration_bounds = array<i64: 2>, scalar_prefetch = 0 : i64, scratch_operands = 0 : i64, tpu.core_type = #tpu.core_type<tc>, window_params = [{transform_indices = @transform_0, window_bounds = array<i64: 8, 32>}, {pipeline_mode = #tpu.pipeline_mode<synchronous>, transform_indices = @transform_1, window_bounds = array<i64: 32, 16>}, {pipeline_mode = #tpu.pipeline_mode<synchronous>, transform_indices = @transform_2, window_bounds = array<i64: 1, 16>}, {pipeline_mode = #tpu.pipeline_mode<synchronous>, transform_indices = @transform_3, window_bounds = array<i64: 16, 2>}, {pipeline_mode = #tpu.pipeline_mode<synchronous>, transform_indices = @transform_4, window_bounds = array<i64: 1, 2>}, {transform_indices = @transform_5, window_bounds = array<i64: 8, 2>}]} {
    %c0 = arith.constant 0 : index
    %c0_0 = arith.constant 0 : index
    %0 = vector.load %arg1[%c0, %c0_0] : memref<8x32xf32, #tpu.memory_space<vmem>>, vector<8x32xf32>
    %1 = arith.truncf %0 : vector<8x32xf32> to vector<8x32xbf16>
    %c0_1 = arith.constant 0 : index
    %c0_2 = arith.constant 0 : index
    %2 = vector.load %arg2[%c0_1, %c0_2] : memref<32x16xbf16, #tpu.memory_space<vmem>>, vector<32x16xbf16>
    %cst = arith.constant dense<0.000000e+00> : vector<8x16xf32>
    %3 = tpu.matmul %1, %2, %cst {dimension_numbers = #tpu.dot_dimension_numbers<[1], [0], [0], [1], [0, 0, 1, 1], [], []>} : vector<8x32xbf16>, vector<32x16xbf16>, vector<8x16xf32> -> vector<8x16xf32>
    %c0_3 = arith.constant 0 : index
    %c0_4 = arith.constant 0 : index
    %4 = vector.load %arg3[%c0_3, %c0_4] : memref<1x16xf32, #tpu.memory_space<vmem>>, vector<1x16xf32>
    %5 = vector.broadcast %4 : vector<1x16xf32> to vector<8x16xf32>
    %6 = arith.addf %3, %5 : vector<8x16xf32>
    %cst_5 = arith.constant 0.000000e+00 : f32
    %7 = vector.broadcast %cst_5 : f32 to vector<8x16xf32>
    %8 = arith.maximumf %6, %7 : vector<8x16xf32>
    %9 = arith.truncf %8 : vector<8x16xf32> to vector<8x16xbf16>
    %c0_6 = arith.constant 0 : index
    %c0_7 = arith.constant 0 : index
    %10 = vector.load %arg4[%c0_6, %c0_7] : memref<16x2xbf16, #tpu.memory_space<vmem>>, vector<16x2xbf16>
    %cst_8 = arith.constant dense<0.000000e+00> : vector<8x2xf32>
    %11 = tpu.matmul %9, %10, %cst_8 {dimension_numbers = #tpu.dot_dimension_numbers<[1], [0], [0], [1], [0, 0, 1, 1], [], []>} : vector<8x16xbf16>, vector<16x2xbf16>, vector<8x2xf32> -> vector<8x2xf32>
    %c0_9 = arith.constant 0 : index
    %c0_10 = arith.constant 0 : index
    %12 = vector.load %arg5[%c0_9, %c0_10] : memref<1x2xf32, #tpu.memory_space<vmem>>, vector<1x2xf32>
    %13 = vector.broadcast %12 : vector<1x2xf32> to vector<8x2xf32>
    %14 = arith.addf %11, %13 : vector<8x2xf32>
    %c0_11 = arith.constant 0 : index
    %c0_12 = arith.constant 0 : index
    %15 = vector.load %arg6[%c0_11, %c0_12] : memref<8x2xf32, #tpu.memory_space<vmem>>, vector<8x2xf32>
    tpu.vector_store %arg6[%c0_11, %c0_12], %14 {strides = array<i32>} : memref<8x2xf32, #tpu.memory_space<vmem>>, vector<8x2xf32>,
    return
  }
  func.func @transform_0(%arg0: i32) -> (i32, i32) {
    %c0_i32 = arith.constant 0 : i32
    %c0_i32_0 = arith.constant 0 : i32
    return %arg0, %c0_i32 : i32, i32
  }
  func.func @transform_1(%arg0: i32) -> (i32, i32) {
    %c0_i32 = arith.constant 0 : i32
    %c0_i32_0 = arith.constant 0 : i32
    %c0_i32_1 = arith.constant 0 : i32
    return %c0_i32, %c0_i32_0 : i32, i32
  }
  func.func @transform_2(%arg0: i32) -> (i32, i32) {
    %c0_i32 = arith.constant 0 : i32
    %c0_i32_0 = arith.constant 0 : i32
    %c0_i32_1 = arith.constant 0 : i32
    return %c0_i32, %c0_i32_0 : i32, i32
  }
  func.func @transform_3(%arg0: i32) -> (i32, i32) {
    %c0_i32 = arith.constant 0 : i32
    %c0_i32_0 = arith.constant 0 : i32
    %c0_i32_1 = arith.constant 0 : i32
    return %c0_i32, %c0_i32_0 : i32, i32
  }
  func.func @transform_4(%arg0: i32) -> (i32, i32) {
    %c0_i32 = arith.constant 0 : i32
    %c0_i32_0 = arith.constant 0 : i32
    %c0_i32_1 = arith.constant 0 : i32
    return %c0_i32, %c0_i32_0 : i32, i32
  }
  func.func @transform_5(%arg0: i32) -> (i32, i32) {
    %c0_i32 = arith.constant 0 : i32
    %c0_i32_0 = arith.constant 0 : i32
    return %arg0, %c0_i32 : i32, i32
  }
}

</mosaic_0001>

<bundles_post_ra>
// kernel: token_classifier_forward.1
= control target key start
LH: loop header
LB: loop body
LE: loop exit
PB: predicated region body
PF: predicated region fallthrough
CT: control target
= control target key end

     0   :  { %s494_s18 = smov 0   ;;  %s526_s0 = inlined_call_operand.vmem [shape: f32[16,32], index: 0, kind: input, shape index: {}]   ;;  %s527_s1 = inlined_call_operand.vmem [shape: bf16[32,16], index: 1, kind: input, shape index: {}]   ;;  %s528_s2 = inlined_call_operand.vmem [shape: f32[1,16], index: 2, kind: input, shape index: {}]   ;;  %s529_s3 = inlined_call_operand.vmem [shape: bf16[16,2], index: 3, kind: input, shape index: {}]   ;;  %s530_s4 = inlined_call_operand.vmem [shape: f32[1,2], index: 4, kind: input, shape index: {}]   ;;  %s531_s5 = inlined_call_operand.vmem [shape: f32[16,2], index: 5, kind: output, shape index: {}]  }
   0x1 LB: > { %s406_s19 = sadd.s32 4294967295, %s460_s18   ;;  %p410_p0 = scmp.ge.s32.totalorder %s460_s18, 1  ;;  %s460_s18 = sphi %s494_s18, %s15_s18  }
   0x2   : > { %p186_p1 = scmp.lt.s32.totalorder %s460_s18, 3 }
   0x4   : > { %p187_p2 = pnand %p410_p0, %p186_p1 }
   0x5   : > { %p212_p3 = scmp.lt.s32.totalorder (!%p187_p2), %s406_s19, 1 }
   0x6   : > { %190 = sbr.rel (%p187_p2) target bundleno = 418 (0x1a2), region = 40 }
   0xb   : > { %v451_v0 = vld [vmem:[%s527_s1 + $0x8] sm:$0xff]   ;;  %v462_v1 = vmov 0.0   ;;  %v452_v2 = vld [vmem:[%s527_s1] sm:$0xff]   ;;  %vm463_vm0 = vmmov 0   ;;  %s533_s19 = smov (!%p212_p3, %s406_s19), 1  ;;  %vm246_vm1 = vcmask 261120  }
   0xc   : > { %427 = vmatprep.subr.bf16.mxu0 %v462_v1  ;;  %435 = vmatprep.subr.bf16.mxu1 %v462_v1  ;;  %s411_s24 = sshll.u32 %s533_s19, 3  ;;  %v453_v5 = vld [vmem:[%s529_s3] sm:$0xff]   ;;  %vm307_vm2 = vcmask 130048   ;;  %vm351_vm3 = vcmask 15360  }
   0xd   : > { %428 = vmatpush3.bf16.msra.mxu0 %v451_v0  ;;  %431 = vmatprep.mubr.msk.bf16.mxu0 %vm463_vm0, %v462_v1  ;;  %s215_s27 = scalar_lea.vmem %s526_s0, %s411_s24  ;;  %v413_v6 = vld [vmem:[%s528_s2] ss:$0 sm:$0xff]  ;;  %s219_s11 = scalar_lea.vmem %s531_s5, %s411_s24 }
   0xe   : > { %429 = vmatprep.subr.bf16.mxu0 %v462_v1  ;;  %437 = vmatprep.mubr.msk.bf16.mxu1 %vm463_vm0, %v462_v1  ;;  %v221_v3 = vld [vmem:[%s215_s27] sm:$0xff] }
   0xf   : > { %v222_v4 = vpack.c.bf16 %v221_v3, %v221_v3  ;;  %436 = vmatpush3.bf16.msra.mxu1 %v453_v5  ;;  %v417_v14 = vld [vmem:[%s530_s4] ss:$0 sm:$0xff] }
  0x11   : > { %430 = vmatpush3.bf16.msra.mxu0 %v452_v2 }
  0x14   : > { %432 = vmatmul.mubr.msk.bf16.vlgmr.msra.gmra.mxu0 %vm246_vm1, %v222_v4 }
  0xd4   : > { %v284_v7 = vpop.f32.mrf.mxu0 }
  0xd5   : > { %v285_v8 = vadd.f32 %v413_v6, %v284_v7 }
  0xd6   : > { %v433_v9 = vpop.f32.mrf.mxu0 }
  0xd7   : > { %v290_v10 = vmax.f32 %v285_v8, 0.0 }
  0xd8   : > { %v287_v11 = vpop.f32.mrf.mxu0 }
  0xd9   : > { %v291_v12 = vpack.c.bf16 %v290_v10, %v290_v10 }
  0xda   : > { %v434_v13 = vpop.f32.mrf.mxu0 }
  0xdb   : > { %438 = vmatmul.mubr.msk.bf16.vlgmr.msra.gmra.mxu1 %vm307_vm2, %v291_v12 }
 0x19b   : > { %v345_v15 = vpop.f32.mrf.mxu1 }
 0x19c   : > { %v346_v16 = vadd.f32 %v417_v14, %v345_v15 }
 0x19d   : > { %v439_v17 = vpop.f32.mrf.mxu1 }
 0x19e   : > { %352 = vst.msk [vmem:[%s219_s11] sm:$0xff] %vm351_vm3, %v346_v16 }
 0x19f   : > { %v348_v18 = vpop.f32.mrf.mxu1 }
 0x1a1   : > { %v440_v19 = vpop.f32.mrf.mxu1 }
 0x1a2 PF: > { %s15_s18 = sadd.s32 1, %s460_s18  }
 0x1a3   : > { %p12_p4 = scmp.ge.s32.totalorder %s15_s18, 4  }
 0x1a5   :  { %14 = sbr.rel (!%p12_p4) target bundleno = 1 (0x1), region = 70 }

</bundles_post_ra>
